<compile_context>
chip_gen: v7x
topology: tpu7x:2x2x1
jax: 0.10.0
libtpu: 0.0.40
codegen_flags: <defaults>
</compile_context>

<pallas_src>
import functools

import jax
import jax.numpy as jnp
from jax import lax
from jax.experimental import pallas as pl
from jax.experimental.pallas import tpu as pltpu

EPS = 1e-5
_TAPS = tuple((dh, dw) for dh in range(3) for dw in range(3))


def _round_up(x, m):
    return ((x + m - 1) // m) * m


def _vmem_limit_bytes():
    # Generation-aware scoped-VMEM limit; leave headroom for double buffers.
    try:
        cap = int(getattr(pltpu.get_tpu_info(), "vmem_capacity_bytes"))
    except Exception:
        cap = 64 * 1024 * 1024
    return int(max(32 * 1024 * 1024, min(int(cap * 0.75), 96 * 1024 * 1024)))


def _compiler_params():
    return pltpu.CompilerParams(dimension_semantics=("parallel",),
                                vmem_limit_bytes=_vmem_limit_bytes())


# ---------------------------------------------------------------------------
# Kernel 1: ConvTranspose2d(kernel=2, stride=2) == one matmul (non-overlapping
# taps), row-tiled, with the pixel shuffle fused into the output layout:
#   out6[g, dh, j, dw*Co + co] = up[n, 2i+dh, 2j+dw, co]   with g = n*H + i
# so out6.reshape(N, 2H, 2W, Co) is a pure (free) reshape.
# ---------------------------------------------------------------------------
def _tconv_kernel(x_ref, w_ref, b_ref, o_ref, *, W, Co, rt):
    # x_ref: (rt*W, Cin) flattened coarse pixels; w_ref: (Cin, 4*Co) [dh,dw,co].
    x = x_ref[...].astype(jnp.bfloat16)
    y = jnp.dot(x, w_ref[...], preferred_element_type=jnp.float32) + b_ref[...]
    for dh in range(2):
        o_ref[:, dh:dh + 1, :, :] = (
            y[:, dh * 2 * Co:(dh + 1) * 2 * Co].reshape(rt, 1, W, 2 * Co))


def tconv2x2_stride2(x_nhwc, w_t, b_t):
    """x: (N,H,W,Cin); w_t: (Cin,Cout,2,2) PyTorch layout; -> (N,2H,2W,Cout)."""
    N, H, W, Cin = x_nhwc.shape
    Co = w_t.shape[1]
    NH = N * H

    # Wflat[ci, (dh*2+dw)*Co + co] = w_t[ci, co, dh, dw]
    w_flat = jnp.transpose(w_t, (0, 2, 3, 1)).reshape(Cin, 4 * Co).astype(jnp.bfloat16)
    b_flat = jnp.tile(b_t, 4).reshape(1, 4 * Co).astype(jnp.float32)

    rt = max(1, min(NH, 2048 // max(W, 1)))          # coarse rows per grid step
    NHp = _round_up(NH, rt)
    x_flat = x_nhwc.reshape(NH * W, Cin)
    if NHp != NH:
        x_flat = jnp.pad(x_flat, ((0, (NHp - NH) * W), (0, 0)))

    kern = functools.partial(_tconv_kernel, W=W, Co=Co, rt=rt)
    out6 = pl.pallas_call(
        kern,
        out_shape=jax.ShapeDtypeStruct((NHp, 2, W, 2 * Co), jnp.float32),
        grid=(NHp // rt,),
        in_specs=[
            pl.BlockSpec((rt * W, Cin), lambda i: (i, 0)),
            pl.BlockSpec((Cin, 4 * Co), lambda i: (0, 0)),
            pl.BlockSpec((1, 4 * Co), lambda i: (0, 0)),
        ],
        out_specs=pl.BlockSpec((rt, 2, W, 2 * Co), lambda i: (i, 0, 0, 0)),
        compiler_params=_compiler_params(),
    )(x_flat, w_flat, b_flat)
    # Already interleaved: this reshape is contiguity-preserving (no HBM pass).
    return out6[:NH].reshape(N, 2 * H, 2 * W, Co)


# ---------------------------------------------------------------------------
# ConvResBlock, pass 1 (per image): fused channel concat, conv0 (1x1),
# conv1 (3x3, shift-accumulate), ReLU, and BN partial sums (sum + sumsq).
# ---------------------------------------------------------------------------
def _crb_pass1_kernel(up_ref, xc_ref, w0_ref, b0_ref, w1_ref, b1_ref,
                      a0_ref, a1_ref, st_ref, xpad,
                      *, Hf, Wf, Cu, Cc, Co):
    Cin = Cu + Cc
    Hp, Wp = Hf + 2, Wf + 2
    M2 = Hf * Wf
    f32 = jnp.float32

    # Stage x = concat([up, xc], ch) into the padded slab (only halo is zeroed).
    xpad[0:1, :, :] = jnp.zeros((1, Wp, Cin), f32)
    xpad[Hp - 1:Hp, :, :] = jnp.zeros((1, Wp, Cin), f32)
    xpad[:, 0:1, :] = jnp.zeros((Hp, 1, Cin), f32)
    xpad[:, Wp - 1:Wp, :] = jnp.zeros((Hp, 1, Cin), f32)
    xpad[1:Hf + 1, 1:Wf + 1, 0:Cu] = up_ref[...].reshape(Hf, Wf, Cu)
    xpad[1:Hf + 1, 1:Wf + 1, Cu:Cin] = xc_ref[...].reshape(Hf, Wf, Cc)

    # branch1: 1x1 conv on the centre window.
    x_center = xpad[1:Hf + 1, 1:Wf + 1, :].reshape(M2, Cin).astype(jnp.bfloat16)
    a0 = jnp.maximum(
        jnp.dot(x_center, w0_ref[...], preferred_element_type=f32) + b0_ref[...],
        0.0)

    # branch2 conv1: 9 shift-accumulated matmuls (no im2col slab).
    acc = jnp.zeros((M2, Co), f32)
    for t, (dh, dw) in enumerate(_TAPS):
        win = xpad[dh:dh + Hf, dw:dw + Wf, :].reshape(M2, Cin).astype(jnp.bfloat16)
        acc = acc + jnp.dot(win, w1_ref[t], preferred_element_type=f32)
    a1 = jnp.maximum(acc + b1_ref[...], 0.0)

    a0_ref[...] = a0.reshape(1, Hf, Wf, Co)
    a1_ref[...] = a1.reshape(1, Hf, Wf, Co)
    # BN partials in one traversal: [sum(a0), sum(a0^2), sum(a1), sum(a1^2)].
    st_ref[...] = jnp.concatenate(
        [jnp.sum(a0, axis=0, keepdims=True),
         jnp.sum(a0 * a0, axis=0, keepdims=True),
         jnp.sum(a1, axis=0, keepdims=True),
         jnp.sum(a1 * a1, axis=0, keepdims=True)], axis=0).reshape(1, 4, Co)


# ---------------------------------------------------------------------------
# ConvResBlock, pass 2 (per image): bn1 affine + conv2 (3x3) + ReLU + partials.
# ---------------------------------------------------------------------------
def _crb_pass2_kernel(a1_ref, aff1_ref, w2_ref, b2_ref,
                      a2_ref, st_ref, ypad, *, Hf, Wf, Co):
    Hp, Wp = Hf + 2, Wf + 2
    M2 = Hf * Wf
    f32 = jnp.float32

    ypad[0:1, :, :] = jnp.zeros((1, Wp, Co), f32)
    ypad[Hp - 1:Hp, :, :] = jnp.zeros((1, Wp, Co), f32)
    ypad[:, 0:1, :] = jnp.zeros((Hp, 1, Co), f32)
    ypad[:, Wp - 1:Wp, :] = jnp.zeros((Hp, 1, Co), f32)

    aff = aff1_ref[...]                                    # (2, Co): [scale; shift]
    t1 = (a1_ref[...].reshape(Hf, Wf, Co) * aff[0:1, :].reshape(1, 1, Co)
          + aff[1:2, :].reshape(1, 1, Co))
    ypad[1:Hf + 1, 1:Wf + 1, :] = t1                       # halo stays 0 ('same' pad)

    acc = jnp.zeros((M2, Co), f32)
    for t, (dh, dw) in enumerate(_TAPS):
        win = ypad[dh:dh + Hf, dw:dw + Wf, :].reshape(M2, Co).astype(jnp.bfloat16)
        acc = acc + jnp.dot(win, w2_ref[t], preferred_element_type=f32)
    a2 = jnp.maximum(acc + b2_ref[...], 0.0)

    a2_ref[...] = a2.reshape(1, Hf, Wf, Co)
    st_ref[...] = jnp.concatenate(
        [jnp.sum(a2, axis=0, keepdims=True),
         jnp.sum(a2 * a2, axis=0, keepdims=True)], axis=0).reshape(1, 2, Co)


# ---------------------------------------------------------------------------
# ConvResBlock, pass 3 (row-tiled elementwise): out = bn0(a0) + bn2(a2).
# ---------------------------------------------------------------------------
def _crb_combine_kernel(a0_ref, a2_ref, aff0_ref, aff2_ref, o_ref):
    aff0 = aff0_ref[...]
    aff2 = aff2_ref[...]
    o_ref[...] = (a0_ref[...] * aff0[0:1, :] + aff0[1:2, :]
                  + a2_ref[...] * aff2[0:1, :] + aff2[1:2, :]).astype(o_ref.dtype)


def _bn_affine(sum_, sumsq, gamma, beta, count):
    mean = sum_ / count
    var = jnp.maximum(sumsq / count - mean * mean, 0.0)    # biased training-mode var
    scale = gamma * lax.rsqrt(var + EPS)
    shift = beta - mean * scale
    return jnp.stack([scale, shift], axis=0).astype(jnp.float32)   # (2, C)


def conv_res_block(up, xc, p):
    N, Hf, Wf, Cu = up.shape
    Cc = xc.shape[-1]
    Cin = Cu + Cc
    Co = p["w0"].shape[0]
    Mtot = N * Hf * Wf

    # PyTorch OIHW -> matmul layouts (weights cast once to bf16 for the MXU).
    w0m = jnp.transpose(p["w0"][:, :, 0, 0], (1, 0)).astype(jnp.bfloat16)          # (Cin, Co)
    w1m = jnp.transpose(p["w1"], (2, 3, 1, 0)).reshape(9, Cin, Co).astype(jnp.bfloat16)
    w2m = jnp.transpose(p["w2"], (2, 3, 1, 0)).reshape(9, Co, Co).astype(jnp.bfloat16)
    row = lambda v: v.reshape(1, -1).astype(jnp.float32)
    cparams = _compiler_params()

    # ---- pass 1 ---------------------------------------------------------------
    p1 = functools.partial(_crb_pass1_kernel, Hf=Hf, Wf=Wf, Cu=Cu, Cc=Cc, Co=Co)
    a0, a1, st1 = pl.pallas_call(
        p1,
        out_shape=(jax.ShapeDtypeStruct((N, Hf, Wf, Co), jnp.float32),
                   jax.ShapeDtypeStruct((N, Hf, Wf, Co), jnp.float32),
                   jax.ShapeDtypeStruct((N, 4, Co), jnp.float32)),
        grid=(N,),
        in_specs=[
            pl.BlockSpec((1, Hf, Wf, Cu), lambda n: (n, 0, 0, 0)),
            pl.BlockSpec((1, Hf, Wf, Cc), lambda n: (n, 0, 0, 0)),
            pl.BlockSpec((Cin, Co), lambda n: (0, 0)),
            pl.BlockSpec((1, Co), lambda n: (0, 0)),
            pl.BlockSpec((9, Cin, Co), lambda n: (0, 0, 0)),
            pl.BlockSpec((1, Co), lambda n: (0, 0)),
        ],
        out_specs=(
            pl.BlockSpec((1, Hf, Wf, Co), lambda n: (n, 0, 0, 0)),
            pl.BlockSpec((1, Hf, Wf, Co), lambda n: (n, 0, 0, 0)),
            pl.BlockSpec((1, 4, Co), lambda n: (n, 0, 0)),
        ),
        scratch_shapes=[pltpu.VMEM((Hf + 2, Wf + 2, Cin), jnp.float32)],
        compiler_params=cparams,
    )(up, xc, w0m, row(p["b0"]), w1m, row(p["b1"]))

    s1 = jnp.sum(st1, axis=0)                                        # (4, Co)
    aff0 = _bn_affine(s1[0], s1[1], p["g0"], p["be0"], Mtot)
    aff1 = _bn_affine(s1[2], s1[3], p["g1"], p["be1"], Mtot)

    # ---- pass 2 ---------------------------------------------------------------
    p2 = functools.partial(_crb_pass2_kernel, Hf=Hf, Wf=Wf, Co=Co)
    a2, st2 = pl.pallas_call(
        p2,
        out_shape=(jax.ShapeDtypeStruct((N, Hf, Wf, Co), jnp.float32),
                   jax.ShapeDtypeStruct((N, 2, Co), jnp.float32)),
        grid=(N,),
        in_specs=[
            pl.BlockSpec((1, Hf, Wf, Co), lambda n: (n, 0, 0, 0)),
            pl.BlockSpec((2, Co), lambda n: (0, 0)),
            pl.BlockSpec((9, Co, Co), lambda n: (0, 0, 0)),
            pl.BlockSpec((1, Co), lambda n: (0, 0)),
        ],
        out_specs=(
            pl.BlockSpec((1, Hf, Wf, Co), lambda n: (n, 0, 0, 0)),
            pl.BlockSpec((1, 2, Co), lambda n: (n, 0, 0)),
        ),
        scratch_shapes=[pltpu.VMEM((Hf + 2, Wf + 2, Co), jnp.float32)],
        compiler_params=cparams,
    )(a1, aff1, w2m, row(p["b2"]))

    s2 = jnp.sum(st2, axis=0)                                        # (2, Co)
    aff2 = _bn_affine(s2[0], s2[1], p["g2"], p["be2"], Mtot)

    # ---- pass 3 ---------------------------------------------------------------
    a0f = a0.reshape(Mtot, Co)
    a2f = a2.reshape(Mtot, Co)
    tr = min(Mtot, 4096)
    Mp = _round_up(Mtot, tr)
    if Mp != Mtot:
        a0f = jnp.pad(a0f, ((0, Mp - Mtot), (0, 0)))
        a2f = jnp.pad(a2f, ((0, Mp - Mtot), (0, 0)))
    out_flat = pl.pallas_call(
        _crb_combine_kernel,
        out_shape=jax.ShapeDtypeStruct((Mp, Co), jnp.float32),
        grid=(Mp // tr,),
        in_specs=[
            pl.BlockSpec((tr, Co), lambda i: (i, 0)),
            pl.BlockSpec((tr, Co), lambda i: (i, 0)),
            pl.BlockSpec((2, Co), lambda i: (0, 0)),
            pl.BlockSpec((2, Co), lambda i: (0, 0)),
        ],
        out_specs=pl.BlockSpec((tr, Co), lambda i: (i, 0)),
        compiler_params=cparams,
    )(a0f, a2f, aff0, aff2)
    return out_flat[:Mtot].reshape(N, Hf, Wf, Co)


# ---------------------------------------------------------------------------
# UpBlock forward (NCHW in / NCHW out, matching PyTorch)
# ---------------------------------------------------------------------------
def upblock_forward(x_down_nchw, x_concat_nchw, p):
    x_down = jnp.transpose(x_down_nchw, (0, 2, 3, 1))      # NHWC
    x_concat = jnp.transpose(x_concat_nchw, (0, 2, 3, 1))
    up = tconv2x2_stride2(x_down, p["tconv_w"], p["tconv_b"])
    out = conv_res_block(up, x_concat, p)                   # concat fused in-kernel
    return jnp.transpose(out, (0, 3, 1, 2))                 # back to NCHW


# ---------------------------------------------------------------------------
# Pure-JAX reference (NCHW, mirrors the PyTorch module) for validation.
# mm_dtype selects the matmul-operand dtype: float32 = exact PyTorch semantics,
# bfloat16 = the same mixed-precision policy the kernels use.
# ---------------------------------------------------------------------------
def _ref_bn_train(y, gamma, beta):
    mean = jnp.mean(y, axis=(0, 2, 3), keepdims=True)
    var = jnp.mean((y - mean) ** 2, axis=(0, 2, 3), keepdims=True)
    return (y - mean) / jnp.sqrt(var + EPS) * gamma[None, :, None, None] \
        + beta[None, :, None, None]


def _ref_conv(x, w, b, mm_dtype):
    y = lax.conv_general_dilated(
        x.astype(mm_dtype), w.astype(mm_dtype), (1, 1), "SAME",
        dimension_numbers=("NCHW", "OIHW", "NCHW"),
        preferred_element_type=jnp.float32,
        precision=lax.Precision.HIGHEST,
    )
    return y + b[None, :, None, None]


def ref_upblock(x_down, x_concat, p, mm_dtype=jnp.float32):
    N, _, H, W = x_down.shape
    Cout = p["tconv_w"].shape[1]
    y = jnp.einsum("ncij,cokl->noikjl",
                   x_down.astype(mm_dtype), p["tconv_w"].astype(mm_dtype),
                   preferred_element_type=jnp.float32,
                   precision=lax.Precision.HIGHEST)
    y = y.reshape(N, Cout, 2 * H, 2 * W) + p["tconv_b"][None, :, None, None]
    x = jnp.concatenate([y, x_concat], axis=1)

    relu = jax.nn.relu
    br1 = _ref_bn_train(relu(_ref_conv(x, p["w0"], p["b0"], mm_dtype)),
                        p["g0"], p["be0"])
    br2 = _ref_bn_train(relu(_ref_conv(x, p["w1"], p["b1"], mm_dtype)),
                        p["g1"], p["be1"])
    br2 = _ref_bn_train(relu(_ref_conv(br2, p["w2"], p["b2"], mm_dtype)),
                        p["g2"], p["be2"])
    return br1 + br2


# ---------------------------------------------------------------------------
if __name__ == "__main__":
    in_ch, out_ch = 8, 4
    N, H, W = 2, 8, 8            # x_down spatial; upsampled to 16x16

    key = jax.random.PRNGKey(0)
    ks = jax.random.split(key, 20)
    nrm = lambda k, s: jax.random.normal(k, s, dtype=jnp.float32)

    params = {
        # ConvTranspose2d(in_ch, out_ch, k=2, s=2): weight (Cin, Cout, 2, 2)
        "tconv_w": 0.2 * nrm(ks[0], (in_ch, out_ch, 2, 2)),
        "tconv_b": 0.1 * nrm(ks[1], (out_ch,)),
        # ConvResBlock(in_ch, out_ch)  (PyTorch OIHW conv weights)
        "w0": 0.2 * nrm(ks[2], (out_ch, in_ch, 1, 1)),
        "b0": 0.1 * nrm(ks[3], (out_ch,)),
        "g0": 1.0 + 0.1 * nrm(ks[4], (out_ch,)),
        "be0": 0.1 * nrm(ks[5], (out_ch,)),
        "w1": 0.2 * nrm(ks[6], (out_ch, in_ch, 3, 3)),
        "b1": 0.1 * nrm(ks[7], (out_ch,)),
        "g1": 1.0 + 0.1 * nrm(ks[8], (out_ch,)),
        "be1": 0.1 * nrm(ks[9], (out_ch,)),
        "w2": 0.2 * nrm(ks[10], (out_ch, out_ch, 3, 3)),
        "b2": 0.1 * nrm(ks[11], (out_ch,)),
        "g2": 1.0 + 0.1 * nrm(ks[12], (out_ch,)),
        "be2": 0.1 * nrm(ks[13], (out_ch,)),
    }

    x_down = nrm(ks[14], (N, in_ch, H, W))                     # NCHW
    x_concat = nrm(ks[15], (N, in_ch - out_ch, 2 * H, 2 * W))  # NCHW skip connection

    out = jax.block_until_ready(upblock_forward(x_down, x_concat, params))
    assert out.shape == (N, out_ch, 2 * H, 2 * W), out.shape

    # Check 1: reference with the SAME mixed-precision policy as the kernels
    # (bf16 matmul operands, f32 accumulation) -> tight tolerance.
    ref_bf = jax.block_until_ready(ref_upblock(x_down, x_concat, params, jnp.bfloat16))
    if not jnp.allclose(out, ref_bf, atol=1e-2, rtol=1e-2):
        err = float(jnp.max(jnp.abs(out - ref_bf)))
        raise AssertionError(f"mismatch vs bf16-policy reference, max abs err = {err}")

    # Check 2: pure-f32 reference (exact PyTorch semantics); looser tolerance only
    # accounts for bf16 operand quantization of the MXU matmuls.
    ref_f32 = jax.block_until_ready(ref_upblock(x_down, x_concat, params, jnp.float32))
    if not jnp.allclose(out, ref_f32, atol=5e-2, rtol=5e-2):
        err = float(jnp.max(jnp.abs(out - ref_f32)))
        raise AssertionError(f"mismatch vs f32 reference, max abs err = {err}")

    print("KERNEL_OK")
</pallas_src>

<mosaic_0001>
module attributes {stable_mosaic.version = 11 : i64} {
  func.func @_tconv_kernel(%arg0: i32, %arg1: memref<128x8xf32, #tpu.memory_space<vmem>>, %arg2: memref<8x16xbf16, #tpu.memory_space<vmem>>, %arg3: memref<1x16xf32, #tpu.memory_space<vmem>>, %arg4: memref<16x2x8x8xf32, #tpu.memory_space<vmem>>) attributes {dimension_semantics = [#tpu.dimension_semantics<parallel>], iteration_bounds = array<i64: 1>, scalar_prefetch = 0 : i64, scratch_operands = 0 : i64, tpu.core_type = #tpu.core_type<tc>, window_params = [{transform_indices = @transform_0, window_bounds = array<i64: 128, 8>}, {pipeline_mode = #tpu.pipeline_mode<synchronous>, transform_indices = @transform_1, window_bounds = array<i64: 8, 16>}, {pipeline_mode = #tpu.pipeline_mode<synchronous>, transform_indices = @transform_2, window_bounds = array<i64: 1, 16>}, {transform_indices = @transform_3, window_bounds = array<i64: 16, 2, 8, 8>}]} {
    %c0 = arith.constant 0 : index
    %c0_0 = arith.constant 0 : index
    %0 = vector.load %arg1[%c0, %c0_0] : memref<128x8xf32, #tpu.memory_space<vmem>>, vector<128x8xf32>
    %1 = arith.truncf %0 : vector<128x8xf32> to vector<128x8xbf16>
    %c0_1 = arith.constant 0 : index
    %c0_2 = arith.constant 0 : index
    %2 = vector.load %arg2[%c0_1, %c0_2] : memref<8x16xbf16, #tpu.memory_space<vmem>>, vector<8x16xbf16>
    %cst = arith.constant dense<0.000000e+00> : vector<128x16xf32>
    %3 = tpu.matmul %1, %2, %cst {dimension_numbers = #tpu.dot_dimension_numbers<[1], [0], [0], [1], [0, 0, 1, 1], [], []>} : vector<128x8xbf16>, vector<8x16xbf16>, vector<128x16xf32> -> vector<128x16xf32>
    %c0_3 = arith.constant 0 : index
    %c0_4 = arith.constant 0 : index
    %4 = vector.load %arg3[%c0_3, %c0_4] : memref<1x16xf32, #tpu.memory_space<vmem>>, vector<1x16xf32>
    %5 = vector.broadcast %4 : vector<1x16xf32> to vector<128x16xf32>
    %6 = arith.addf %3, %5 : vector<128x16xf32>
    %7 = vector.extract_strided_slice %6 {offsets = [0, 0], sizes = [128, 8], strides = [1, 1]} : vector<128x16xf32> to vector<128x8xf32>
    %8 = vector.shape_cast %7 : vector<128x8xf32> to vector<16x1x8x8xf32>
    %c0_5 = arith.constant 0 : index
    %c0_6 = arith.constant 0 : index
    %c0_7 = arith.constant 0 : index
    %c0_8 = arith.constant 0 : index
    %9 = vector.load %arg4[%c0_5, %c0_6, %c0_7, %c0_8] : memref<16x2x8x8xf32, #tpu.memory_space<vmem>>, vector<16x1x8x8xf32>
    tpu.vector_store %arg4[%c0_5, %c0_6, %c0_7, %c0_8], %8 {strides = array<i32>} : memref<16x2x8x8xf32, #tpu.memory_space<vmem>>, vector<16x1x8x8xf32>,
    %10 = vector.extract_strided_slice %6 {offsets = [0, 8], sizes = [128, 8], strides = [1, 1]} : vector<128x16xf32> to vector<128x8xf32>
    %11 = vector.shape_cast %10 : vector<128x8xf32> to vector<16x1x8x8xf32>
    %c0_9 = arith.constant 0 : index
    %c1 = arith.constant 1 : index
    %c0_10 = arith.constant 0 : index
    %c0_11 = arith.constant 0 : index
    %12 = vector.load %arg4[%c0_9, %c1, %c0_10, %c0_11] : memref<16x2x8x8xf32, #tpu.memory_space<vmem>>, vector<16x1x8x8xf32>
    tpu.vector_store %arg4[%c0_9, %c1, %c0_10, %c0_11], %11 {strides = array<i32>} : memref<16x2x8x8xf32, #tpu.memory_space<vmem>>, vector<16x1x8x8xf32>,
    return
  }
  func.func @transform_0(%arg0: i32) -> (i32, i32) {
    %c0_i32 = arith.constant 0 : i32
    %c0_i32_0 = arith.constant 0 : i32
    return %arg0, %c0_i32 : i32, i32
  }
  func.func @transform_1(%arg0: i32) -> (i32, i32) {
    %c0_i32 = arith.constant 0 : i32
    %c0_i32_0 = arith.constant 0 : i32
    %c0_i32_1 = arith.constant 0 : i32
    return %c0_i32, %c0_i32_0 : i32, i32
  }
  func.func @transform_2(%arg0: i32) -> (i32, i32) {
    %c0_i32 = arith.constant 0 : i32
    %c0_i32_0 = arith.constant 0 : i32
    %c0_i32_1 = arith.constant 0 : i32
    return %c0_i32, %c0_i32_0 : i32, i32
  }
  func.func @transform_3(%arg0: i32) -> (i32, i32, i32, i32) {
    %c0_i32 = arith.constant 0 : i32
    %c0_i32_0 = arith.constant 0 : i32
    %c0_i32_1 = arith.constant 0 : i32
    %c0_i32_2 = arith.constant 0 : i32
    return %arg0, %c0_i32, %c0_i32_0, %c0_i32_1 : i32, i32, i32, i32
  }
}

</mosaic_0001>

<bundles_post_ra>
// kernel: tpu_custom_call.1
= control target key start
LH: loop header
LB: loop body
LE: loop exit
PB: predicated region body
PF: predicated region fallthrough
CT: control target
= control target key end

     0   :  { %vm72_vm0 = vcmask 1043456   ;;  %vm47_vm1 = vcmask 64512   ;;  %s558_s1 = inlined_call_operand.vmem [shape: bf16[8,16], index: 1, kind: input, shape index: {}]   ;;  %s559_s0 = inlined_call_operand.vmem [shape: f32[128,8], index: 0, kind: input, shape index: {}]   ;;  %s560_s2 = inlined_call_operand.vmem [shape: f32[1,16], index: 2, kind: input, shape index: {}]   ;;  %s561_s3 = inlined_call_operand.vmem [shape: f32[16,2,8,8], index: 3, kind: output, shape index: {}]  }
   0x1   :  { %v39_v0 = vld [vmem:[%s558_s1] sm:$0xf]  ;;  %v16_v2 = vld [vmem:[%s559_s0 + $0x8] sm:$0xff]  ;;  %v17_v7 = vld [vmem:[%s559_s0 + $0x10] sm:$0xff] }
   0x2   :  { %v15_v1 = vld [vmem:[%s559_s0] sm:$0xff]  ;;  %328 = vmatprep.subr.msk.bf16.mxu0 %vm72_vm0, %v39_v0  ;;  %329 = vmatprep.subr.msk.bf16.mxu1 %vm72_vm0, %v39_v0  ;;  %v74_v3 = vsel %vm72_vm0, %v39_v0, 0  ;;  %v24_v6 = vld [vmem:[%s559_s0 + $0x48] sm:$0xff]  ;;  %v18_v9 = vld [vmem:[%s559_s0 + $0x18] sm:$0xff] }
   0x3   :  { %v31_v4 = vpack.c.bf16 %v16_v2, %v15_v1  ;;  %v23_v5 = vld [vmem:[%s559_s0 + $0x40] sm:$0xff]  ;;  %309 = vmatpush3.bf16.msra.mxu0 %v74_v3  ;;  %327 = vmatpush3.bf16.msra.mxu1 %v74_v3  ;;  %v25_v10 = vld [vmem:[%s559_s0 + $0x50] sm:$0xff]  ;;  %v26_v11 = vld [vmem:[%s559_s0 + $0x58] sm:$0xff]  ;;  %v32_v12 = vpack.c.bf16 %v18_v9, %v17_v7 }
   0x4   :  { %v35_v8 = vpack.c.bf16 %v24_v6, %v23_v5  ;;  %v36_v13 = vpack.c.bf16 %v26_v11, %v25_v10  ;;  %v19_v14 = vld [vmem:[%s559_s0 + $0x20] sm:$0xff]  ;;  %v20_v15 = vld [vmem:[%s559_s0 + $0x28] sm:$0xff]  ;;  %v21_v19 = vld [vmem:[%s559_s0 + $0x30] sm:$0xff] }
   0x5   :  { %310 = vmatprep.mubr.msk.bf16.mxu0 %vm47_vm1, %v31_v4  ;;  %v33_v16 = vpack.c.bf16 %v20_v15, %v19_v14  ;;  %v27_v17 = vld [vmem:[%s559_s0 + $0x60] sm:$0xff]  ;;  %v28_v18 = vld [vmem:[%s559_s0 + $0x68] sm:$0xff]  ;;  %v22_v21 = vld [vmem:[%s559_s0 + $0x38] sm:$0xff] }
   0x6   :  { %318 = vmatprep.mubr.msk.bf16.mxu1 %vm47_vm1, %v35_v8  ;;  %311 = vmatmul.mubr.msk.bf16.vlgmr.msra.gmra.mrb[0].mxu0 %vm47_vm1, %v32_v12  ;;  %v37_v20 = vpack.c.bf16 %v28_v18, %v27_v17  ;;  %v29_v22 = vld [vmem:[%s559_s0 + $0x70] sm:$0xff]  ;;  %v30_v23 = vld [vmem:[%s559_s0 + $0x78] sm:$0xff]  ;;  %v34_v24 = vpack.c.bf16 %v22_v21, %v21_v19  ;;  %v274_v26 = vld [vmem:[%s560_s2] ss:$0 sm:$0xff]  ;;  %s331_s2 = smov 120  }
   0x7   :  { %319 = vmatmul.mubr.msk.bf16.vlgmr.msra.gmra.mrb[0].mxu1 %vm47_vm1, %v36_v13  ;;  %314 = vmatprep.mubr.msk.bf16.mxu0 %vm47_vm1, %v33_v16  ;;  %v38_v25 = vpack.c.bf16 %v30_v23, %v29_v22 }
   0x8   :  { %322 = vmatprep.mubr.msk.bf16.mxu1 %vm47_vm1, %v37_v20 }
   0xe   :  { %315 = vmatmul.mubr.msk.bf16.gmra.mrb[4].mxu0 %vm47_vm1, %v34_v24 }
   0xf   :  { %323 = vmatmul.mubr.msk.bf16.gmra.mrb[4].mxu1 %vm47_vm1, %v38_v25 }
  0xd9   :  { %v312_v27 = vpop.f32.mrb[0].mxu0 }
  0xda   :  { %v320_v28 = vpop.f32.mrb[0].mxu1  ;;  %v119_v29 = vadd.f32 %v312_v27, %v274_v26  ;;  %v110_v31 = vpop.f32.mrb[1].mxu0 }
  0xdb   :  { %v151_v30 = vadd.f32 %v320_v28, %v274_v26  ;;  %v142_v32 = vpop.f32.mrb[1].mxu1  ;;  %v111_v33 = vadd.f32 %v274_v26, %v110_v31  ;;  %v313_v35 = vpop.f32.mrb[2].mxu0 }
  0xdc   :  { %v143_v34 = vadd.f32 %v274_v26, %v142_v32  ;;  %v321_v36 = vpop.f32.mrb[2].mxu1  ;;  %175 = vst.msk [vmem:[%s561_s3 + $0x20] sm:$0xff] %vm47_vm1, %v119_v29  ;;  %v122_v37 = vadd.f32 %v313_v35, %v274_v26  ;;  %209 = vrot.lane.b32.xlu1 %v119_v29, %s331_s2  ;;  %v113_v40 = vpop.f32.mrb[3].mxu0 }
  0xdd   :  { %183 = vst.msk [vmem:[%s561_s3 + $0xa0] sm:$0xff] %vm47_vm1, %v151_v30  ;;  %v154_v38 = vadd.f32 %v321_v36, %v274_v26  ;;  %225 = vrot.lane.b32.xlu0 %v151_v30, %s331_s2  ;;  %v145_v39 = vpop.f32.mrb[3].mxu1  ;;  %173 = vst.msk [vmem:[%s561_s3] sm:$0xff] %vm47_vm1, %v111_v33  ;;  %v114_v42 = vadd.f32 %v274_v26, %v113_v40 }
  0xde   :  { %181 = vst.msk [vmem:[%s561_s3 + $0x80] sm:$0xff] %vm47_vm1, %v143_v34  ;;  %v146_v41 = vadd.f32 %v274_v26, %v145_v39  ;;  %176 = vst.msk [vmem:[%s561_s3 + $0x30] sm:$0xff] %vm47_vm1, %v122_v37 }
  0xdf   :  { %184 = vst.msk [vmem:[%s561_s3 + $0xb0] sm:$0xff] %vm47_vm1, %v154_v38  ;;  %174 = vst.msk [vmem:[%s561_s3 + $0x10] sm:$0xff] %vm47_vm1, %v114_v42 }
  0xe0   :  { %182 = vst.msk [vmem:[%s561_s3 + $0x90] sm:$0xff] %vm47_vm1, %v146_v41  ;;  %211 = vrot.lane.b32.xlu1 %v122_v37, %s331_s2 }
  0xe1   :  { %205 = vrot.lane.b32.xlu0 %v111_v33, %s331_s2  ;;  %v316_v43 = vpop.f32.mrb[4].mxu0 }
  0xe2   :  { %v324_v44 = vpop.f32.mrb[4].mxu1  ;;  %v135_v45 = vadd.f32 %v316_v43, %v274_v26  ;;  %v126_v46 = vpop.f32.mrb[5].mxu0 }
  0xe3   :  { %v167_v47 = vadd.f32 %v324_v44, %v274_v26  ;;  %v158_v48 = vpop.f32.mrb[5].mxu1  ;;  %v127_v49 = vadd.f32 %v274_v26, %v126_v46  ;;  %v317_v50 = vpop.f32.mrb[6].mxu0 }
  0xe4   :  { %v159_v51 = vadd.f32 %v274_v26, %v158_v48  ;;  %v325_v52 = vpop.f32.mrb[6].mxu1  ;;  %227 = vrot.lane.b32.xlu1 %v154_v38, %s331_s2  ;;  %179 = vst.msk [vmem:[%s561_s3 + $0x60] sm:$0xff] %vm47_vm1, %v135_v45  ;;  %v138_v53 = vadd.f32 %v317_v50, %v274_v26  ;;  %v129_v54 = vpop.f32.mrb[7].mxu0 }
  0xe5   :  { %221 = vrot.lane.b32.xlu0 %v143_v34, %s331_s2  ;;  %187 = vst.msk [vmem:[%s561_s3 + $0xe0] sm:$0xff] %vm47_vm1, %v167_v47  ;;  %v170_v55 = vadd.f32 %v325_v52, %v274_v26  ;;  %v161_v56 = vpop.f32.mrb[7].mxu1  ;;  %177 = vst.msk [vmem:[%s561_s3 + $0x40] sm:$0xff] %vm47_vm1, %v127_v49  ;;  %v130_v57 = vadd.f32 %v274_v26, %v129_v54 }
  0xe6   :  { %185 = vst.msk [vmem:[%s561_s3 + $0xc0] sm:$0xff] %vm47_vm1, %v159_v51  ;;  %v162_v58 = vadd.f32 %v274_v26, %v161_v56  ;;  %180 = vst.msk [vmem:[%s561_s3 + $0x70] sm:$0xff] %vm47_vm1, %v138_v53 }
  0xe7   :  { %188 = vst.msk [vmem:[%s561_s3 + $0xf0] sm:$0xff] %vm47_vm1, %v170_v55  ;;  %178 = vst.msk [vmem:[%s561_s3 + $0x50] sm:$0xff] %vm47_vm1, %v130_v57 }
  0xe8   :  { %186 = vst.msk [vmem:[%s561_s3 + $0xd0] sm:$0xff] %vm47_vm1, %v162_v58  ;;  %223 = vrot.lane.b32.xlu1 %v146_v41, %s331_s2 }
  0xe9   :  { %207 = vrot.lane.b32.xlu0 %v114_v42, %s331_s2 }
  0xec   :  { %219 = vrot.lane.b32.xlu1 %v138_v53, %s331_s2 }
  0xed   :  { %217 = vrot.lane.b32.xlu0 %v135_v45, %s331_s2 }
  0xf0   :  { %215 = vrot.lane.b32.xlu1 %v130_v57, %s331_s2 }
  0xf1   :  { %213 = vrot.lane.b32.xlu0 %v127_v49, %s331_s2 }
  0xf4   :  { %231 = vrot.lane.b32.xlu1 %v162_v58, %s331_s2 }
  0xf5   :  { %229 = vrot.lane.b32.xlu0 %v159_v51, %s331_s2 }
  0xf8   :  { %235 = vrot.lane.b32.xlu1 %v170_v55, %s331_s2 }
  0xf9   :  { %233 = vrot.lane.b32.xlu0 %v167_v47, %s331_s2 }
 0x14e   :  { %v210_v60 = vpop.permute.xlu1 %209 }
 0x14f   :  { %v226_v59 = vpop.permute.xlu0 %225  ;;  %285 = vst.msk [vmem:[%s561_s3 + $0x28] sm:$0xff] %vm47_vm1, %v210_v60 }
 0x150   :  { %293 = vst.msk [vmem:[%s561_s3 + $0xa8] sm:$0xff] %vm47_vm1, %v226_v59 }
 0x152   :  { %v212_v61 = vpop.permute.xlu1 %211 }
 0x153   :  { %v206_v62 = vpop.permute.xlu0 %205  ;;  %286 = vst.msk [vmem:[%s561_s3 + $0x38] sm:$0xff] %vm47_vm1, %v212_v61 }
 0x154   :  { %283 = vst.msk [vmem:[%s561_s3 + $0x8] sm:$0xff] %vm47_vm1, %v206_v62 }
 0x156   :  { %v228_v63 = vpop.permute.xlu1 %227 }
 0x157   :  { %v222_v0 = vpop.permute.xlu0 %221  ;;  %294 = vst.msk [vmem:[%s561_s3 + $0xb8] sm:$0xff] %vm47_vm1, %v228_v63 }
 0x158   :  { %291 = vst.msk [vmem:[%s561_s3 + $0x88] sm:$0xff] %vm47_vm1, %v222_v0 }
 0x15a   :  { %v224_v1 = vpop.permute.xlu1 %223 }
 0x15b   :  { %v208_v2 = vpop.permute.xlu0 %207  ;;  %292 = vst.msk [vmem:[%s561_s3 + $0x98] sm:$0xff] %vm47_vm1, %v224_v1 }
 0x15c   :  { %284 = vst.msk [vmem:[%s561_s3 + $0x18] sm:$0xff] %vm47_vm1, %v208_v2 }
 0x15e   :  { %v220_v3 = vpop.permute.xlu1 %219 }
 0x15f   :  { %v218_v4 = vpop.permute.xlu0 %217  ;;  %290 = vst.msk [vmem:[%s561_s3 + $0x78] sm:$0xff] %vm47_vm1, %v220_v3 }
 0x160   :  { %289 = vst.msk [vmem:[%s561_s3 + $0x68] sm:$0xff] %vm47_vm1, %v218_v4 }
 0x162   :  { %v216_v5 = vpop.permute.xlu1 %215 }
 0x163   :  { %v214_v6 = vpop.permute.xlu0 %213  ;;  %288 = vst.msk [vmem:[%s561_s3 + $0x58] sm:$0xff] %vm47_vm1, %v216_v5 }
 0x164   :  { %287 = vst.msk [vmem:[%s561_s3 + $0x48] sm:$0xff] %vm47_vm1, %v214_v6 }
 0x166   :  { %v232_v7 = vpop.permute.xlu1 %231 }
 0x167   :  { %v230_v8 = vpop.permute.xlu0 %229  ;;  %296 = vst.msk [vmem:[%s561_s3 + $0xd8] sm:$0xff] %vm47_vm1, %v232_v7 }
 0x168   :  { %295 = vst.msk [vmem:[%s561_s3 + $0xc8] sm:$0xff] %vm47_vm1, %v230_v8 }
 0x16a   :  { %v236_v9 = vpop.permute.xlu1 %235 }
 0x16b   :  { %v234_v10 = vpop.permute.xlu0 %233  ;;  %298 = vst.msk [vmem:[%s561_s3 + $0xf8] sm:$0xff] %vm47_vm1, %v236_v9 }
 0x16c   :  { %297 = vst.msk [vmem:[%s561_s3 + $0xe8] sm:$0xff] %vm47_vm1, %v234_v10 }

</bundles_post_ra>
